<compile_context>
chip_gen: v5e
topology: v5e:2x2
jax: 0.10.0
libtpu: 0.0.40
codegen_flags: <defaults>
</compile_context>

<pallas_src>
import functools

import jax
import jax.numpy as jnp
from jax.experimental import pallas as pl
from jax.experimental.pallas import tpu as pltpu


def _mod(a, n):
    """a % n, using a cheap bitwise-and when n is a power of two."""
    if (n & (n - 1)) == 0:
        return jnp.bitwise_and(a, n - 1)
    return a % n


def _convblock_kernel(x_ref, w_ref, b_ref, a_ref, o_ref, *, H, W):
    # x_ref: (Cin, L)         images folded into lanes (L = n_img * H*W)
    # w_ref: (3, Cout, 3*Cin) dw-major fused weights: w_ref[kw][co, kh*Cin+ci]
    # b_ref: (Cout, 1)        bias column (broadcasts along lanes)
    # a_ref: (1,)             PReLU slope, SMEM
    # o_ref: (Cout, L)        lane-dense output block
    L = x_ref.shape[1]
    HW = H * W

    x = x_ref[...].astype(jnp.float32)                      # (Cin, L), one load

    # Per-image boundary masks, built once from an iota (cheap VPU work).
    m_idx = jax.lax.broadcasted_iota(jnp.int32, (1, L), 1)
    p_idx = _mod(m_idx, HW)                                 # position inside image
    w_idx = _mod(p_idx, W)                                  # column inside row
    h_ok_m1 = p_idx >= W                                    # source row h-1 exists
    h_ok_p1 = p_idx < (HW - W)                              # source row h+1 exists
    w_ok_m1 = w_idx >= 1                                    # source col w-1 exists
    w_ok_p1 = w_idx < (W - 1)                               # source col w+1 exists

    # Fuse the 3 row taps into the contraction dim: S = (3*Cin, L).
    #   S_top[m] = x[m-W] (kh=0), S_mid = x (kh=1), S_bot[m] = x[m+W] (kh=2).
    # Lane rolls wrap across image/block boundaries; the h-masks zero exactly
    # those lanes, reproducing zero padding.
    s_top = jnp.where(h_ok_m1, pltpu.roll(x, shift=W, axis=1), 0.0)
    s_bot = jnp.where(h_ok_p1, pltpu.roll(x, shift=(-W) % L, axis=1), 0.0)
    s = jnp.concatenate([s_top, x, s_bot], axis=0)          # (3*Cin, L)

    # 3 MXU matmuls (one per kw) instead of 9.
    def tap(dw, d):
        if dw == -1:
            d = jnp.where(w_ok_m1, d, 0.0)
        elif dw == 1:
            d = jnp.where(w_ok_p1, d, 0.0)
        return jax.lax.dot_general(
            w_ref[dw + 1].astype(jnp.float32), d,           # (Cout, 3*Cin) @ (3*Cin, L)
            dimension_numbers=(((1,), (0,)), ((), ())),
            preferred_element_type=jnp.float32)

    acc = tap(-1, pltpu.roll(s, shift=1, axis=1))
    acc = acc + tap(0, s)
    acc = acc + tap(1, pltpu.roll(s, shift=L - 1, axis=1))

    # Bias + PReLU (shared alpha) epilogue.
    pre = acc + b_ref[...].astype(jnp.float32)
    alpha = a_ref[0]
    out = jnp.where(pre > 0, pre, alpha * pre)
    o_ref[...] = out.astype(o_ref.dtype)                    # dense lane store


def _num_parallel_blocks():
    """2 on chips with two TensorCores per JAX device (v7x / megacore), else 1."""
    try:
        kind = jax.devices()[0].device_kind.lower()
    except Exception:
        return 1
    if "v5e" in kind or "lite" in kind or "v6" in kind:
        return 1                       # single TC: collapse the grid (saves ~0.35 us)
    if "v4" in kind or "v5p" in kind or "v7" in kind or "7x" in kind:
        return 2                       # two TCs: keep a 2-way "parallel" axis
    return 1


def conv_block(x, w, b, alpha):
    """x: (B, Cin, H, W) NCHW float32 (as in the PyTorch module);
       w: (3, 3, Cin, Cout) HWIO; b: (Cout,); alpha: scalar PReLU slope."""
    B, Cin, H, W_ = x.shape
    Cout = w.shape[-1]
    HW = H * W_
    L = B * HW

    # Pure layout plumbing on tiny tensors (no extra passes over activations).
    x_packed = jnp.transpose(x.reshape(B, Cin, HW), (1, 0, 2)).reshape(Cin, L)
    # dw-major fused weights: w_packed[kw, co, kh*Cin + ci] = w[kh, kw, ci, co].
    w_packed = jnp.transpose(w, (1, 3, 0, 2)).reshape(3, Cout, 3 * Cin).astype(jnp.float32)
    b_col = b.reshape(Cout, 1).astype(jnp.float32)
    a_smem = jnp.asarray(alpha, jnp.float32).reshape(1)

    # Grid split: only split lanes if each block holds whole images and stays
    # a multiple of 128 lanes (keeps stores unmasked).
    n_blocks = _num_parallel_blocks()
    if n_blocks > 1 and not (B % n_blocks == 0 and ((B // n_blocks) * HW) % 128 == 0):
        n_blocks = 1
    Lb = L // n_blocks

    kernel = functools.partial(_convblock_kernel, H=H, W=W_)

    out_packed = pl.pallas_call(
        kernel,
        out_shape=jax.ShapeDtypeStruct((Cout, L), x.dtype),
        grid=(n_blocks,),
        in_specs=[
            pl.BlockSpec((Cin, Lb), lambda i: (0, i)),
            pl.BlockSpec((3, Cout, 3 * Cin), lambda i: (0, 0, 0)),
            pl.BlockSpec((Cout, 1), lambda i: (0, 0)),
            pl.BlockSpec(memory_space=pltpu.MemorySpace.SMEM),
        ],
        out_specs=pl.BlockSpec((Cout, Lb), lambda i: (0, i)),
        compiler_params=pltpu.CompilerParams(
            dimension_semantics=("parallel",)),
    )(x_packed, w_packed, b_col, a_smem)

    return jnp.transpose(out_packed.reshape(Cout, B, HW), (1, 0, 2)).reshape(B, Cout, H, W_)


def conv_block_reference(x, w, b, alpha):
    """Pure-JAX reference: conv2d (stride 1, pad 1) + bias + PReLU, NCHW/HWIO."""
    out = jax.lax.conv_general_dilated(
        x, w, window_strides=(1, 1), padding=((1, 1), (1, 1)),
        dimension_numbers=("NCHW", "HWIO", "NCHW"))
    out = out + b[None, :, None, None]
    return jnp.where(out > 0, out, alpha * out)


if __name__ == "__main__":
    # ConvBlock(input_size=4, output_size=8) on a small NCHW input.
    B, Cin, Cout, H, W = 2, 4, 8, 16, 16

    key = jax.random.PRNGKey(0)
    kx, kwt, kb = jax.random.split(key, 3)

    x = jax.random.normal(kx, (B, Cin, H, W), dtype=jnp.float32)
    # Deterministic synthetic parameters (Conv2d-like uniform init, HWIO layout).
    fan_in = Cin * 3 * 3
    bound = 1.0 / (fan_in ** 0.5)
    w = jax.random.uniform(kwt, (3, 3, Cin, Cout), jnp.float32, -bound, bound)
    b = jax.random.uniform(kb, (Cout,), jnp.float32, -bound, bound)
    alpha = jnp.float32(0.25)  # torch.nn.PReLU() default init

    out = conv_block(x, w, b, alpha)
    out = jax.block_until_ready(out)

    ref = conv_block_reference(x, w, b, alpha)
    assert out.shape == (B, Cout, H, W)
    assert jnp.allclose(out, ref, atol=1e-4, rtol=1e-4), "mismatch vs reference"

    print("KERNEL_OK")
</pallas_src>

<mosaic_0001>
module attributes {stable_mosaic.version = 11 : i64} {
  func.func @_convblock_kernel(%arg0: i32, %arg1: memref<4x512xf32, #tpu.memory_space<vmem>>, %arg2: memref<3x8x12xf32, #tpu.memory_space<vmem>>, %arg3: memref<8x1xf32, #tpu.memory_space<vmem>>, %arg4: memref<1xf32, #tpu.memory_space<smem>>, %arg5: memref<8x512xf32, #tpu.memory_space<vmem>>) attributes {dimension_semantics = [#tpu.dimension_semantics<parallel>], iteration_bounds = array<i64: 1>, scalar_prefetch = 0 : i64, scratch_operands = 0 : i64, tpu.core_type = #tpu.core_type<tc>, window_params = [{transform_indices = @transform_0, window_bounds = array<i64: 4, 512>}, {pipeline_mode = #tpu.pipeline_mode<synchronous>, transform_indices = @transform_1, window_bounds = array<i64: 3, 8, 12>}, {pipeline_mode = #tpu.pipeline_mode<synchronous>, transform_indices = @transform_2, window_bounds = array<i64: 8, 1>}, {transform_indices = @transform_3, window_bounds = array<i64: 1>}, {transform_indices = @transform_4, window_bounds = array<i64: 8, 512>}]} {
    %c0 = arith.constant 0 : index
    %c0_0 = arith.constant 0 : index
    %0 = vector.load %arg1[%c0, %c0_0] : memref<4x512xf32, #tpu.memory_space<vmem>>, vector<4x512xf32>
    %1 = tpu.iota {dimensions = array<i32: 1>} : vector<1x512xi32>
    %c255_i32 = arith.constant 255 : i32
    %2 = vector.broadcast %c255_i32 : i32 to vector<1x512xi32>
    %3 = arith.andi %1, %2 : vector<1x512xi32>
    %c15_i32 = arith.constant 15 : i32
    %4 = vector.broadcast %c15_i32 : i32 to vector<1x512xi32>
    %5 = arith.andi %3, %4 : vector<1x512xi32>
    %c16_i32 = arith.constant 16 : i32
    %6 = vector.broadcast %c16_i32 : i32 to vector<1x512xi32>
    %7 = arith.cmpi sge, %3, %6 : vector<1x512xi32>
    %c240_i32 = arith.constant 240 : i32
    %8 = vector.broadcast %c240_i32 : i32 to vector<1x512xi32>
    %9 = arith.cmpi slt, %3, %8 : vector<1x512xi32>
    %c1_i32 = arith.constant 1 : i32
    %10 = vector.broadcast %c1_i32 : i32 to vector<1x512xi32>
    %11 = arith.cmpi sge, %5, %10 : vector<1x512xi32>
    %c15_i32_1 = arith.constant 15 : i32
    %12 = vector.broadcast %c15_i32_1 : i32 to vector<1x512xi32>
    %13 = arith.cmpi slt, %5, %12 : vector<1x512xi32>
    %c16_i32_2 = arith.constant 16 : i32
    %14 = tpu.dynamic_rotate %0 by %c16_i32_2 dim 1 : vector<4x512xf32>, i32 -> vector<4x512xf32>
    %cst = arith.constant 0.000000e+00 : f32
    %15 = vector.shape_cast %7 : vector<1x512xi1> to vector<1x512xi1>
    %16 = vector.broadcast %15 : vector<1x512xi1> to vector<4x512xi1>
    %17 = vector.broadcast %cst : f32 to vector<4x512xf32>
    %18 = arith.select %16, %14, %17 : vector<4x512xi1>, vector<4x512xf32>
    %c496_i32 = arith.constant 496 : i32
    %19 = tpu.dynamic_rotate %0 by %c496_i32 dim 1 : vector<4x512xf32>, i32 -> vector<4x512xf32>
    %cst_3 = arith.constant 0.000000e+00 : f32
    %20 = vector.shape_cast %9 : vector<1x512xi1> to vector<1x512xi1>
    %21 = vector.broadcast %20 : vector<1x512xi1> to vector<4x512xi1>
    %22 = vector.broadcast %cst_3 : f32 to vector<4x512xf32>
    %23 = arith.select %21, %19, %22 : vector<4x512xi1>, vector<4x512xf32>
    %24 = tpu.concatenate %18, %0, %23 in 0 : vector<4x512xf32>, vector<4x512xf32>, vector<4x512xf32> -> vector<12x512xf32>
    %c1_i32_4 = arith.constant 1 : i32
    %25 = tpu.dynamic_rotate %24 by %c1_i32_4 dim 1 : vector<12x512xf32>, i32 -> vector<12x512xf32>
    %cst_5 = arith.constant 0.000000e+00 : f32
    %26 = vector.shape_cast %11 : vector<1x512xi1> to vector<1x512xi1>
    %27 = vector.broadcast %26 : vector<1x512xi1> to vector<12x512xi1>
    %28 = vector.broadcast %cst_5 : f32 to vector<12x512xf32>
    %29 = arith.select %27, %25, %28 : vector<12x512xi1>, vector<12x512xf32>
    %c0_6 = arith.constant 0 : index
    %c0_7 = arith.constant 0 : index
    %c0_8 = arith.constant 0 : index
    %30 = vector.load %arg2[%c0_6, %c0_7, %c0_8] : memref<3x8x12xf32, #tpu.memory_space<vmem>>, vector<1x8x12xf32>
    %31 = vector.shape_cast %30 : vector<1x8x12xf32> to vector<8x12xf32>
    %cst_9 = arith.constant dense<0.000000e+00> : vector<8x512xf32>
    %32 = tpu.matmul %31, %29, %cst_9 {dimension_numbers = #tpu.dot_dimension_numbers<[1], [0], [0], [1], [0, 0, 1, 1], [], []>} : vector<8x12xf32>, vector<12x512xf32>, vector<8x512xf32> -> vector<8x512xf32>
    %c1 = arith.constant 1 : index
    %c0_10 = arith.constant 0 : index
    %c0_11 = arith.constant 0 : index
    %33 = vector.load %arg2[%c1, %c0_10, %c0_11] : memref<3x8x12xf32, #tpu.memory_space<vmem>>, vector<1x8x12xf32>
    %34 = vector.shape_cast %33 : vector<1x8x12xf32> to vector<8x12xf32>
    %cst_12 = arith.constant dense<0.000000e+00> : vector<8x512xf32>
    %35 = tpu.matmul %34, %24, %cst_12 {dimension_numbers = #tpu.dot_dimension_numbers<[1], [0], [0], [1], [0, 0, 1, 1], [], []>} : vector<8x12xf32>, vector<12x512xf32>, vector<8x512xf32> -> vector<8x512xf32>
    %36 = arith.addf %32, %35 : vector<8x512xf32>
    %c511_i32 = arith.constant 511 : i32
    %37 = tpu.dynamic_rotate %24 by %c511_i32 dim 1 : vector<12x512xf32>, i32 -> vector<12x512xf32>
    %cst_13 = arith.constant 0.000000e+00 : f32
    %38 = vector.shape_cast %13 : vector<1x512xi1> to vector<1x512xi1>
    %39 = vector.broadcast %38 : vector<1x512xi1> to vector<12x512xi1>
    %40 = vector.broadcast %cst_13 : f32 to vector<12x512xf32>
    %41 = arith.select %39, %37, %40 : vector<12x512xi1>, vector<12x512xf32>
    %c2 = arith.constant 2 : index
    %c0_14 = arith.constant 0 : index
    %c0_15 = arith.constant 0 : index
    %42 = vector.load %arg2[%c2, %c0_14, %c0_15] : memref<3x8x12xf32, #tpu.memory_space<vmem>>, vector<1x8x12xf32>
    %43 = vector.shape_cast %42 : vector<1x8x12xf32> to vector<8x12xf32>
    %cst_16 = arith.constant dense<0.000000e+00> : vector<8x512xf32>
    %44 = tpu.matmul %43, %41, %cst_16 {dimension_numbers = #tpu.dot_dimension_numbers<[1], [0], [0], [1], [0, 0, 1, 1], [], []>} : vector<8x12xf32>, vector<12x512xf32>, vector<8x512xf32> -> vector<8x512xf32>
    %45 = arith.addf %36, %44 : vector<8x512xf32>
    %c0_17 = arith.constant 0 : index
    %c0_18 = arith.constant 0 : index
    %46 = vector.load %arg3[%c0_17, %c0_18] : memref<8x1xf32, #tpu.memory_space<vmem>>, vector<8x1xf32>
    %47 = vector.broadcast %46 : vector<8x1xf32> to vector<8x512xf32>
    %48 = arith.addf %45, %47 : vector<8x512xf32>
    %c0_19 = arith.constant 0 : index
    %49 = memref.load %arg4[%c0_19] : memref<1xf32, #tpu.memory_space<smem>>
    %cst_20 = arith.constant 0.000000e+00 : f32
    %50 = vector.broadcast %cst_20 : f32 to vector<8x512xf32>
    %51 = arith.cmpf ogt, %48, %50 : vector<8x512xf32>
    %52 = vector.broadcast %49 : f32 to vector<8x512xf32>
    %53 = arith.mulf %52, %48 : vector<8x512xf32>
    %54 = arith.select %51, %48, %53 : vector<8x512xi1>, vector<8x512xf32>
    %c0_21 = arith.constant 0 : index
    %c0_22 = arith.constant 0 : index
    %55 = vector.load %arg5[%c0_21, %c0_22] : memref<8x512xf32, #tpu.memory_space<vmem>>, vector<8x512xf32>
    tpu.vector_store %arg5[%c0_21, %c0_22], %54 {strides = array<i32>} : memref<8x512xf32, #tpu.memory_space<vmem>>, vector<8x512xf32>,
    return
  }
  func.func @transform_0(%arg0: i32) -> (i32, i32) {
    %c0_i32 = arith.constant 0 : i32
    %c0_i32_0 = arith.constant 0 : i32
    return %c0_i32, %arg0 : i32, i32
  }
  func.func @transform_1(%arg0: i32) -> (i32, i32, i32) {
    %c0_i32 = arith.constant 0 : i32
    %c0_i32_0 = arith.constant 0 : i32
    %c0_i32_1 = arith.constant 0 : i32
    %c0_i32_2 = arith.constant 0 : i32
    return %c0_i32, %c0_i32_0, %c0_i32_1 : i32, i32, i32
  }
  func.func @transform_2(%arg0: i32) -> (i32, i32) {
    %c0_i32 = arith.constant 0 : i32
    %c0_i32_0 = arith.constant 0 : i32
    %c0_i32_1 = arith.constant 0 : i32
    return %c0_i32, %c0_i32_0 : i32, i32
  }
  func.func @transform_3(%arg0: i32) -> i32 {
    %c0_i32 = arith.constant 0 : i32
    %c0_i32_0 = arith.constant 0 : i32
    return %c0_i32 : i32
  }
  func.func @transform_4(%arg0: i32) -> (i32, i32) {
    %c0_i32 = arith.constant 0 : i32
    %c0_i32_0 = arith.constant 0 : i32
    return %c0_i32, %arg0 : i32, i32
  }
}

</mosaic_0001>

<bundles_post_ra>
// kernel: tpu_custom_call.1
= control target key start
LH: loop header
LB: loop body
LE: loop exit
PB: predicated region body
PF: predicated region fallthrough
CT: control target
= control target key end

     0   :  { %10 = vsyncpa [#allocation4], 0  ;;  %s881_s0 = inlined_call_operand.hbm [shape: f32[4,512], index: 0, kind: input, shape index: {}]   ;;  %s882_s1 = inlined_call_operand.hbm [shape: f32[3,8,12], index: 1, kind: input, shape index: {}]   ;;  %s883_s2 = inlined_call_operand.vmem [shape: f32[8,1], index: 2, kind: input, shape index: {}]   ;;  %s884_s3 = inlined_call_operand.<no memory space> [shape: f32[1], index: 3, kind: input, shape index: {}]   ;;  %s885_s4 = inlined_call_operand.hbm [shape: f32[8,512], index: 4, kind: output, shape index: {}]  }
   0x1   :  { %11 = vsyncpa [#allocation7], 0 }
   0x2   :  { %12 = vsyncpa [#allocation5], 0  ;;  %s18_s17 = sshll.u32 %s881_s0, 4  ;;  %s715_s18 = smov [#allocation3]   ;;  %s19_s17 = int_to_ptr.hbm [resolvable:$true] %s18_s17 }
   0x3   :  { %s20_s19 = sshll.u32 %s715_s18, 4  ;;  %s28_s22 = sshll.u32 %s882_s1, 4  ;;  %s21_s19 = int_to_ptr.vmem [resolvable:$true] %s20_s19  ;;  %s29_s22 = int_to_ptr.hbm [resolvable:$true] %s28_s22 }
   0x4   :  { %23 = dma.hbm_to_vmem [thread:$0]  %s19_s17, 256, %s21_s19, [#allocation4]  }
   0x5   :  { %s716_s23 = smov [#allocation6]   ;;  %s717_s25 = smov 128  }
   0x6   :  { %s30_s24 = sshll.u32 %s716_s23, 4  ;;  %s718_s26 = smov 8   ;;  %s31_s24 = int_to_ptr.vmem [resolvable:$true] %s30_s24 }
   0x7   :  { %36 = dma.hbm_to_vmem [thread:$0]  %s29_s22, 384, %s31_s24, [#allocation7], %s717_s25, %s717_s25, %s718_s26  }
   0x8   :  { %709 = dma.done.wait [#allocation4], 256  }
   0x9   :  { %710 = vsyncadd [#allocation4], 4294967040 }
   0xa   :  { %711 = dma.done.wait [#allocation7], 384  }
   0xb   :  { %712 = vsyncadd [#allocation7], 4294966912  ;;  %v50_v0 = vld [vmem:[#allocation3 + $0x8] sm:$0xff]  ;;  %v49_v1 = vld [vmem:[#allocation3] sm:$0xff]  ;;  %s719_s0 = smov 16   ;;  %s720_s1 = smov 112   ;;  %v51_v10 = vlaneseq }
   0xc   :  { %84 = vst [vmem:[#allocation1 + $0x10] ss:$2 sm:$0xff] %v50_v0  ;;  %vm166_vm2 = vcmask 1043456   ;;  %s721_s27 = smov 1   ;;  %s722_s28 = smov 127   ;;  %v214_v47 = vld [vmem:[#allocation6 + $0x8] sm:$0xff] }
   0xd   :  { %82 = vst [vmem:[#allocation1] ss:$2 sm:$0xff] %v49_v1  ;;  %v756_v11 = vand.u32 127, %v51_v10  ;;  %vm215_vm7 = vcmask 97280   ;;  %v212_v58 = vld [vmem:[#allocation6] sm:$0xff]  ;;  %v548_v60 = vld [vmem:[%s883_s2] sm:$0xff] }
   0xe   :  { %v723_v61 = vmov 0   ;;  %s724_s6 = smov [#allocation8]  }
   0xf   :  { %v759_v12 = vadd.s32 256, %v756_v11  ;;  %vm101_vm0 = vcmp.lt.s32.totalorder %v756_v11, 16  ;;  %v770_v20 = vadd.s32 384, %v756_v11  ;;  %v53_v22 = vadd.s32 128, %v756_v11  ;;  %636 = vset.pattern.permute.xlu0 %v723_v61  ;;  %s581_s7 = sshll.u32 %s724_s6, 4  ;;  %s582_s7 = int_to_ptr.vmem [resolvable:$true] %s581_s7 }
  0x10   :  { %vm137_vm3 = vcmp.lt.s32.totalorder %v756_v11, 112  ;;  %v56_v34 = vand.u32 255, %v756_v11  ;;  %vm187_vm9 = vcmp.lt.s32.totalorder %v756_v11, 1  ;;  %vm422_vm10 = vcmp.lt.s32.totalorder %v756_v11, 127 }
  0x11   :  { %v58_v14 = vand.u32 255, %v759_v12  ;;  %v59_v24 = vand.u32 255, %v770_v20  ;;  %v57_v25 = vand.u32 255, %v53_v22  ;;  %v448_v22 = vld [vmem:[#allocation6 + $0x10] sm:$0xff] }
  0x12   :  { %vm64_vm6 = vcmp.ge.s32.totalorder %v56_v34, 16 }
  0x13   :  { %v87_v2 = vld.sshfl [vmem:[#allocation1 + $0x10] sm:$0xff pattern:$0x75316420]  ;;  %v88_v3 = vld.sshfl [vmem:[#allocation1 + $0x18] sm:$0xff pattern:$0x75316420] }
  0x14   :  { %120 = vst [vmem:[#allocation1 + $0x10] ss:$2 sm:$0xff] %v50_v0  ;;  %v85_v4 = vld.sshfl [vmem:[#allocation1] sm:$0xff pattern:$0x75316420]  ;;  %vm66_vm1 = vcmp.ge.s32.totalorder %v58_v14, 16 }
  0x15   :  { %v86_v5 = vld.sshfl [vmem:[#allocation1 + $0x8] sm:$0xff pattern:$0x75316420]  ;;  %vm71_vm4 = vcmp.lt.s32.totalorder %v59_v24, 240  ;;  %vm69_vm5 = vcmp.lt.s32.totalorder %v57_v25, 240  ;;  %v804_v50 = vand.u32 15, %v57_v25 }
  0x16   :  { %118 = vst [vmem:[#allocation1] ss:$2 sm:$0xff] %v49_v1  ;;  %95 = vrot.lane.b32.xlu2 %v86_v5, %s719_s0  ;;  %v62_v59 = vand.u32 15, %v58_v14 }
  0x17   :  { %vm73_vm8 = vcmp.ge.s32.totalorder %v804_v50, 1 }
  0x18   :  { %vm74_vm11 = vcmp.ge.s32.totalorder %v62_v59, 1  ;;  %vm78_vm12 = vcmp.lt.s32.totalorder %v62_v59, 15 }
  0x1b   :  { %v123_v6 = vld.sshfl [vmem:[#allocation1 + $0x10] sm:$0xff pattern:$0x75316420]  ;;  %v124_v7 = vld.sshfl [vmem:[#allocation1 + $0x18] sm:$0xff pattern:$0x75316420] }
  0x1c   :  { %133 = vrot.lane.b32.xlu1 %v123_v6, %s720_s1  ;;  %157 = vst [vmem:[#allocation1 + $0x11] ss:$2 sm:$0xff] %v50_v0  ;;  %v63_v0 = vand.u32 15, %v59_v24 }
  0x1d   :  { %v121_v8 = vld.sshfl [vmem:[#allocation1] sm:$0xff pattern:$0x75316420]  ;;  %v122_v9 = vld.sshfl [vmem:[#allocation1 + $0x8] sm:$0xff pattern:$0x75316420] }
  0x1e   :  { %129 = vrot.lane.b32.xlu0 %v121_v8, %s720_s1  ;;  %155 = vst [vmem:[#allocation1 + $0x1] ss:$2 sm:$0xff] %v49_v1  ;;  %97 = vrot.lane.b32.xlu2 %v87_v2, %s719_s0  ;;  %v60_v1 = vand.u32 15, %v56_v34  ;;  %vm75_vm14 = vcmp.ge.s32.totalorder %v63_v0, 1  ;;  %vm79_vm15 = vcmp.lt.s32.totalorder %v63_v0, 15 }
  0x20   :  { %vm72_vm13 = vcmp.ge.s32.totalorder %v60_v1, 1 }
  0x23   :  { %v160_v16 = vld.sshfl [vmem:[#allocation1 + $0x10] sm:$0xff pattern:$0x75316420]  ;;  %v161_v35 = vld.sshfl [vmem:[#allocation1 + $0x18] sm:$0xff pattern:$0x75316420] }
  0x24   :  { %135 = vrot.lane.b32.xlu1 %v124_v7, %s720_s1 }
  0x25   :  { %v159_v38 = vld.sshfl [vmem:[#allocation1 + $0x8] sm:$0xff pattern:$0x75316420]  ;;  %v158_v41 = vld.sshfl [vmem:[#allocation1] sm:$0xff pattern:$0x75316420] }
  0x26   :  { %131 = vrot.lane.b32.xlu0 %v122_v9, %s720_s1 }
  0x2c   :  { %99 = vrot.lane.b32.xlu1 %v88_v3, %s719_s0 }
  0x2e   :  { %93 = vrot.lane.b32.xlu0 %v85_v4, %s719_s0 }
  0x70   :  { %v96_v13 = vpop.permute.xlu2 %95 }
  0x78   :  { %v98_v15 = vpop.permute.xlu2 %97 }
  0x79   :  { %v103_v17 = vsel %vm101_vm0, %v96_v13, %v98_v15 }
  0x7a   :  { %v116_v18 = vsel %vm66_vm1, %v103_v17, 0.0  ;;  %vm77_vm1 = vcmp.lt.s32.totalorder %v804_v50, 15 }
  0x7b   :  { %v169_v19 = vsel %vm166_vm2, %v116_v18, %v160_v16 }
  0x7c   :  { %179 = vrot.lane.b32.xlu0 %v169_v19, %s721_s27 }
  0x8e   :  { %v134_v21 = vpop.permute.xlu1 %133 }
  0x90   :  { %v130_v23 = vpop.permute.xlu0 %129 }
  0x96   :  { %v136_v26 = vpop.permute.xlu1 %135 }
  0x97   :  { %v141_v27 = vsel %vm137_vm3, %v136_v26, %v130_v23  ;;  %v138_v28 = vsel %vm137_vm3, %v134_v21, %v136_v26 }
  0x98   :  { %v132_v29 = vpop.permute.xlu0 %131  ;;  %598 = vmatpush.msk.msra.mxu2 %vm166_vm2, %v138_v28  ;;  %v153_v30 = vsel %vm71_vm4, %v141_v27, 0.0 }
  0x99   :  { %v139_v31 = vsel %vm137_vm3, %v132_v29, %v134_v21  ;;  %v140_v32 = vsel %vm137_vm3, %v130_v23, %v132_v29  ;;  %600 = vmatpush.msk.msra.mxu3 %vm166_vm2, %v153_v30 }
  0x9a   :  { %594 = vmatpush.msk.msra.mxu0 %vm166_vm2, %v140_v32  ;;  %v151_v33 = vsel %vm69_vm5, %v139_v31, 0.0  ;;  %286 = vmatpush.msra.mxu2 %v169_v19 }
  0x9b   :  { %596 = vmatpush.msk.msra.mxu1 %vm166_vm2, %v151_v33  ;;  %599 = vmatmul.msk.f32.vlgmr.msra.gmra.mxu2 %vm215_vm7, %v214_v47 }
  0x9e   :  { %v100_v36 = vpop.permute.xlu1 %99 }
  0x9f   :  { %v102_v37 = vsel %vm101_vm0, %v98_v15, %v100_v36 }
  0xa0   :  { %v94_v39 = vpop.permute.xlu0 %93  ;;  %v170_v40 = vsel %vm166_vm2, %v102_v37, %v161_v35 }
  0xa1   :  { %v104_v42 = vsel %vm101_vm0, %v94_v39, %v96_v13  ;;  %v105_v43 = vsel %vm101_vm0, %v100_v36, %v94_v39  ;;  %183 = vrot.lane.b32.xlu1 %v170_v40, %s721_s27  ;;  %306 = vmatpush.msra.mxu3 %v170_v40  ;;  %vm76_vm0 = vcmp.lt.s32.totalorder %v60_v1, 15 }
  0xa2   :  { %v114_v44 = vsel %vm64_vm6, %v105_v43, 0.0  ;;  %v168_v45 = vsel %vm166_vm2, %v104_v42, %v159_v38  ;;  %601 = vmatmul.msk.f32.vlgmr.msra.gmra.mxu3 %vm215_vm7, %v214_v47 }
  0xa3   :  { %175 = vrot.lane.b32.xlu2 %v168_v45, %s721_s27  ;;  %266 = vmatpush.msra.mxu1 %v168_v45  ;;  %v167_v46 = vsel %vm166_vm2, %v114_v44, %v158_v41 }
  0xa4   :  { %171 = vrot.lane.b32.xlu0 %v167_v46, %s721_s27  ;;  %246 = vmatpush.msra.mxu0 %v167_v46 }
  0xa5   :  { %595 = vmatmul.msk.f32.vlgmr.msra.gmra.mxu0 %vm215_vm7, %v214_v47  ;;  %597 = vmatmul.msk.f32.vlgmr.msra.gmra.mxu1 %vm215_vm7, %v214_v47 }
  0xa9   :  { %416 = vrot.lane.b32.xlu1 %v138_v28, %s722_s28 }
  0xab   :  { %173 = vrot.lane.b32.xlu2 %v140_v32, %s721_s27 }
  0xac   :  { %181 = vrot.lane.b32.xlu0 %v138_v28, %s721_s27 }
  0xb1   :  { %185 = vrot.lane.b32.xlu1 %v153_v30, %s721_s27 }
  0xb3   :  { %177 = vrot.lane.b32.xlu2 %v151_v33, %s721_s27 }
  0xb4   :  { %408 = vrot.lane.b32.xlu0 %v140_v32, %s722_s28 }
  0xb9   :  { %406 = vrot.lane.b32.xlu1 %v167_v46, %s722_s28 }
  0xbb   :  { %420 = vrot.lane.b32.xlu2 %v153_v30, %s722_s28 }
  0xbc   :  { %418 = vrot.lane.b32.xlu0 %v170_v40, %s722_s28 }
  0xc1   :  { %412 = vrot.lane.b32.xlu1 %v151_v33, %s722_s28 }
  0xc3   :  { %414 = vrot.lane.b32.xlu2 %v169_v19, %s722_s28 }
  0xc4   :  { %551 = vperm.xlu0 %636, %v548_v60  }
  0xcb   :  { %410 = vrot.lane.b32.xlu2 %v168_v45, %s722_s28 }
  0xee   :  { %v180_v52 = vpop.permute.xlu0 %179 }
  0xfd   :  { %v176_v48 = vpop.permute.xlu2 %175 }
  0xfe   :  { %v190_v6 = vsel %vm187_vm9, %v176_v48, %v180_v52 }
 0x105   :  { %v174_v49 = vpop.permute.xlu2 %173 }
 0x10d   :  { %v178_v51 = vpop.permute.xlu2 %177 }
 0x10e   :  { %v193_v53 = vsel %vm187_vm9, %v174_v49, %v178_v51 }
 0x10f   :  { %v209_v54 = vsel %vm73_vm8, %v193_v53, 0.0 }
 0x110   :  { %605 = vmatpush.msk.msrb.mxu1 %vm166_vm2, %v209_v54 }
 0x113   :  { %v184_v55 = vpop.permute.xlu1 %183 }
 0x114   :  { %v188_v17 = vsel %vm187_vm9, %v180_v52, %v184_v55 }
 0x115   :  { %v421_v2 = vpop.permute.xlu2 %420 }
 0x116   :  { %v172_v56 = vpop.permute.xlu0 %171 }
 0x117   :  { %v192_v57 = vsel %vm187_vm9, %v172_v56, %v176_v48  ;;  %v194_v16 = vsel %vm187_vm9, %v184_v55, %v172_v56 }
 0x118   :  { %606 = vmatpush.msk.msrb.mxu1 %vm73_vm8, %v192_v57 }
 0x119   :  { %607 = vmatmul.msk.f32.vlgmr.msrb.gmra.mxu1 %vm215_vm7, %v212_v58 }
 0x11b   :  { %v417_v62 = vpop.permute.xlu1 %416 }
 0x11c   :  { %v424_v4 = vsel %vm422_vm10, %v417_v62, %v421_v2 }
 0x11d   :  { %v445_v7 = vsel %vm78_vm12, %v424_v4, 0.0  ;;  %v415_v19 = vpop.permute.xlu2 %414 }
 0x11e   :  { %v182_v63 = vpop.permute.xlu0 %181  ;;  %v288_v33 = vpop.f32.mrf.mxu2 }
 0x11f   :  { %v191_v3 = vsel %vm187_vm9, %v178_v51, %v182_v63 }
 0x120   :  { %v210_v5 = vsel %vm74_vm11, %v191_v3, 0.0 }
 0x121   :  { %608 = vmatpush.msk.msrb.mxu2 %vm166_vm2, %v210_v5 }
 0x122   :  { %v248_v35 = vpop.f32.mrf.mxu0  ;;  %v268_v36 = vpop.f32.mrf.mxu1 }
 0x123   :  { %609 = vmatpush.msk.msrb.mxu2 %vm74_vm11, %v190_v6  ;;  %v186_v8 = vpop.permute.xlu1 %185 }
 0x124   :  { %v189_v9 = vsel %vm187_vm9, %v182_v63, %v186_v8  ;;  %v195_v10 = vsel %vm187_vm9, %v186_v8, %v174_v49  ;;  %610 = vmatmul.msk.f32.vlgmr.msrb.gmra.mxu2 %vm215_vm7, %v212_v58  ;;  %v563_v49 = vstv %s884_s3  ;;  %s583_s3 = sshll.u32 %s885_s4, 4  ;;  %s584_s3 = int_to_ptr.hbm [resolvable:$true] %s583_s3 }
 0x125   :  { %620 = vmatpush.msk.msra.mxu2 %vm166_vm2, %v445_v7  ;;  %v208_v12 = vsel %vm72_vm13, %v195_v10, 0.0  ;;  %v211_v13 = vsel %vm75_vm14, %v189_v9, 0.0  ;;  %v411_v26 = vpop.permute.xlu2 %410  ;;  %v308_v34 = vpop.f32.mrf.mxu3 }
 0x126   :  { %v409_v14 = vpop.permute.xlu0 %408  ;;  %602 = vmatpush.msk.msrb.mxu0 %vm166_vm2, %v208_v12  ;;  %611 = vmatpush.msk.msrb.mxu3 %vm166_vm2, %v211_v13  ;;  %v425_v31 = vsel %vm422_vm10, %v411_v26, %v415_v19 }
 0x127   :  { %v430_v15 = vsel %vm422_vm10, %v421_v2, %v409_v14 }
 0x128   :  { %603 = vmatpush.msk.msrb.mxu0 %vm72_vm13, %v194_v16  ;;  %612 = vmatpush.msk.msrb.mxu3 %vm75_vm14, %v188_v17  ;;  %v446_v18 = vsel %vm79_vm15, %v430_v15, 0.0 }
 0x129   :  { %613 = vmatmul.msk.f32.vlgmr.msrb.gmra.mxu3 %vm215_vm7, %v212_v58  ;;  %604 = vmatmul.msk.f32.vlgmr.msrb.gmra.mxu0 %vm215_vm7, %v212_v58 }
 0x12a   :  { %623 = vmatpush.msk.msra.mxu3 %vm166_vm2, %v446_v18 }
 0x12b   :  { %v407_v20 = vpop.permute.xlu1 %406 }
 0x12c   :  { %v427_v32 = vsel %vm422_vm10, %v407_v20, %v411_v26 }
 0x12e   :  { %v419_v21 = vpop.permute.xlu0 %418 }
 0x12f   :  { %v423_v23 = vsel %vm422_vm10, %v415_v19, %v419_v21  ;;  %v429_v24 = vsel %vm422_vm10, %v419_v21, %v407_v20 }
 0x130   :  { %621 = vmatpush.msk.msra.mxu2 %vm78_vm12, %v423_v23  ;;  %624 = vmatpush.msk.msra.mxu3 %vm79_vm15, %v429_v24 }
 0x131   :  { %622 = vmatmul.msk.f32.vlgmr.msra.gmra.mxu2 %vm215_vm7, %v448_v22  ;;  %625 = vmatmul.msk.f32.vlgmr.msra.gmra.mxu3 %vm215_vm7, %v448_v22 }
 0x133   :  { %v413_v25 = vpop.permute.xlu1 %412 }
 0x134   :  { %v426_v27 = vsel %vm422_vm10, %v413_v25, %v417_v62  ;;  %v428_v28 = vsel %vm422_vm10, %v409_v14, %v413_v25 }
 0x135   :  { %v443_v29 = vsel %vm76_vm0, %v428_v28, 0.0  ;;  %v444_v30 = vsel %vm77_vm1, %v426_v27, 0.0 }
 0x136   :  { %614 = vmatpush.msk.msra.mxu0 %vm166_vm2, %v443_v29  ;;  %617 = vmatpush.msk.msra.mxu1 %vm166_vm2, %v444_v30  ;;  %v552_v43 = vpop.permute.xlu0 %551 }
 0x138   :  { %615 = vmatpush.msk.msra.mxu0 %vm76_vm0, %v427_v32  ;;  %618 = vmatpush.msk.msra.mxu1 %vm77_vm1, %v425_v31 }
 0x139   :  { %616 = vmatmul.msk.f32.vlgmr.msra.gmra.mxu0 %vm215_vm7, %v448_v22  ;;  %619 = vmatmul.msk.f32.vlgmr.msra.gmra.mxu1 %vm215_vm7, %v448_v22 }
 0x196   :  { %v363_v40 = vpop.f32.mrf.mxu1 }
 0x197   :  { %v364_v46 = vadd.f32 %v363_v40, %v268_v36 }
 0x1a6   :  { %v343_v39 = vpop.f32.mrf.mxu0 }
 0x1a7   :  { %v383_v37 = vpop.f32.mrf.mxu2  ;;  %v344_v45 = vadd.f32 %v343_v39, %v248_v35 }
 0x1a8   :  { %v384_v41 = vadd.f32 %v383_v37, %v288_v33 }
 0x1ac   :  { %v403_v38 = vpop.f32.mrf.mxu3 }
 0x1ad   :  { %v404_v42 = vadd.f32 %v403_v38, %v308_v34 }
 0x1b4   :  { %v521_v44 = vpop.f32.mrf.mxu2  ;;  %v541_v11 = vpop.f32.mrf.mxu3 }
 0x1b5   :  { %v546_v47 = vadd.f32 %v521_v44, %v384_v41  ;;  %v547_v48 = vadd.f32 %v541_v11, %v404_v42 }
 0x1b6   :  { %v481_v50 = vpop.f32.mrf.mxu0  ;;  %v501_v51 = vpop.f32.mrf.mxu1 }
 0x1b7   :  { %v556_v52 = vadd.f32 %v552_v43, %v546_v47  ;;  %v557_v53 = vadd.f32 %v552_v43, %v547_v48  ;;  %v544_v54 = vadd.f32 %v481_v50, %v344_v45  ;;  %v545_v55 = vadd.f32 %v501_v51, %v364_v46 }
 0x1b9   :  { %vm561_vm2 = vcmp.gt.f32.partialorder %v556_v52, 0.0  ;;  %vm562_vm3 = vcmp.gt.f32.partialorder %v557_v53, 0.0  ;;  %v566_v56 = vmul.f32 %v563_v49, %v556_v52  ;;  %v567_v57 = vmul.f32 %v563_v49, %v557_v53 }
 0x1ba   :  { %v554_v58 = vadd.f32 %v552_v43, %v544_v54  ;;  %v555_v59 = vadd.f32 %v552_v43, %v545_v55 }
 0x1bb   :  { %v570_v60 = vsel %vm561_vm2, %v556_v52, %v566_v56  ;;  %v571_v61 = vsel %vm562_vm3, %v557_v53, %v567_v57 }
 0x1bc   :  { %574 = vst [vmem:[#allocation8 + $0x10] sm:$0xff] %v570_v60  ;;  %vm559_vm4 = vcmp.gt.f32.partialorder %v554_v58, 0.0  ;;  %v564_v62 = vmul.f32 %v563_v49, %v554_v58  ;;  %vm560_vm5 = vcmp.gt.f32.partialorder %v555_v59, 0.0  ;;  %v565_v63 = vmul.f32 %v563_v49, %v555_v59 }
 0x1bd   :  { %575 = vst [vmem:[#allocation8 + $0x18] sm:$0xff] %v571_v61 }
 0x1be   :  { %v568_v0 = vsel %vm559_vm4, %v554_v58, %v564_v62  ;;  %v569_v1 = vsel %vm560_vm5, %v555_v59, %v565_v63 }
 0x1bf   :  { %572 = vst [vmem:[#allocation8] sm:$0xff] %v568_v0 }
 0x1c0   :  { %573 = vst [vmem:[#allocation8 + $0x8] sm:$0xff] %v569_v1 }
 0x1c1   :  { %586 = dma.vmem_to_hbm [thread:$0]  %s582_s7, 512, %s584_s3, [#allocation5]  }
 0x1c2   :  { %713 = dma.done.wait [#allocation5], 512  }
 0x1c3   :  { %714 = vsyncadd [#allocation5], 4294966784 }
 0x1c4   :  { %591 = vsyncpa [#allocation4], 1 }
 0x1c5   :  { %592 = vsyncpa [#allocation7], 1 }
 0x1c6   :  { %593 = vsyncpa [#allocation5], 1 }

</bundles_post_ra>
